<compile_context>
chip_gen: v5e
topology: v5e:2x2
jax: 0.10.0
libtpu: 0.0.40
codegen_flags: <defaults>
</compile_context>

<pallas_src>
import jax
import jax.numpy as jnp
from jax.experimental import pallas as pl
from jax.experimental.pallas import tpu as pltpu

_LANE = 128
_TARGET_BLOCK_BYTES = 4 * 1024 * 1024  # ~4 MiB per block


def _round_up(x, m):
    return ((x + m - 1) // m) * m


def _led_kernel(scale_ref, z_ref, o_ref):
    # scale_ref: SMEM [1] f32 holding (1 - dt*alpha); one vmul per vreg.
    o_ref[...] = (z_ref[...] * scale_ref[0]).astype(o_ref.dtype)


def led_forward(z, dt, alpha, *, donate=False):
    """y_hat = z - dt * alpha * z for an arbitrary-shaped array z."""
    orig_shape = z.shape
    total = int(z.size)
    dtype = z.dtype
    itemsize = jnp.dtype(dtype).itemsize

    # Fold scalars into one f32 scale (scalar path, not per-element work).
    scale = (jnp.float32(1.0)
             - jnp.asarray(dt, jnp.float32) * jnp.asarray(alpha, jnp.float32)
             ).reshape((1,))

    flat = z.reshape(-1)

    # 128-divisible prefix goes through the kernel; tiny tail via plain jnp.
    prefix = (total // _LANE) * _LANE
    tail = total - prefix

    if prefix == 0:
        return (flat * scale[0]).astype(dtype).reshape(orig_shape)

    main = flat if tail == 0 else flat[:prefix]

    # Widen the lane (last) dim when divisibility allows.
    lanes = _LANE
    for cand in (1024, 512, 256):
        if prefix % cand == 0:
            lanes = cand
            break
    rows = prefix // lanes
    z2d = main.reshape(rows, lanes)

    # Tile selection: ~4 MiB sublane-aligned blocks; small tensors -> 1 block.
    sublane = max(8, 32 // itemsize)  # 8 for f32, 16 for bf16
    target_rows = max(sublane, _TARGET_BLOCK_BYTES // (lanes * itemsize))
    target_rows = _round_up(target_rows, sublane)
    if rows <= target_rows:
        tile_rows = rows            # single block == full array dims (legal)
        grid = (1,)
    else:
        tile_rows = target_rows     # (8,128)-aligned; ragged last block masked
        grid = (pl.cdiv(rows, tile_rows),)

    cost = pl.CostEstimate(
        flops=prefix,
        transcendentals=0,
        bytes_accessed=2 * prefix * itemsize,
    )

    out2d = pl.pallas_call(
        _led_kernel,
        out_shape=jax.ShapeDtypeStruct((rows, lanes), dtype),
        grid=grid,
        in_specs=[
            pl.BlockSpec(memory_space=pltpu.MemorySpace.SMEM),   # [scale]
            pl.BlockSpec((tile_rows, lanes), lambda i: (i, 0)),  # z tile
        ],
        out_specs=pl.BlockSpec((tile_rows, lanes), lambda i: (i, 0)),
        compiler_params=pltpu.CompilerParams(
            dimension_semantics=("parallel",),
            vmem_limit_bytes=32 * 1024 * 1024,
        ),
        cost_estimate=cost,
        input_output_aliases={1: 0} if donate else {},
    )(scale, z2d)

    out_main = out2d.reshape(-1)
    if tail == 0:
        return out_main.reshape(orig_shape)
    out_tail = (flat[prefix:] * scale[0]).astype(dtype)
    return jnp.concatenate([out_main, out_tail]).reshape(orig_shape)


class LedParams:
    """Deterministic parameter init mirroring led.__init__ (init_phys=None)."""

    def __init__(self, init_phys=None):
        if init_phys is not None:
            self.alpha = jnp.float32(init_phys)
        else:
            self.alpha = jnp.float32(0.5)
        self.beta = jnp.float32(0.0)  # unused in forward (kept for parity)
        self.order = 1


if __name__ == "__main__":
    key = jax.random.PRNGKey(0)
    params = LedParams()  # alpha = 0.5
    dt = 0.1

    # Small NCHW input (single-block, widened-lane path).
    z_small = jax.random.normal(key, (2, 4, 16, 16), dtype=jnp.float32)
    y_small = jax.block_until_ready(led_forward(z_small, dt, params.alpha))
    ref_small = z_small - jnp.float32(dt) * params.alpha * z_small
    assert y_small.shape == z_small.shape
    assert jnp.allclose(y_small, ref_small, atol=1e-6, rtol=1e-6), "small-shape mismatch"

    # Non-128-divisible shape: exercises the prefix-kernel + jnp-tail path.
    z_odd = jax.random.normal(key, (2, 4, 17, 13), dtype=jnp.float32)
    y_odd = jax.block_until_ready(led_forward(z_odd, dt, params.alpha))
    ref_odd = z_odd - jnp.float32(dt) * params.alpha * z_odd
    assert y_odd.shape == z_odd.shape
    assert jnp.allclose(y_odd, ref_odd, atol=1e-6, rtol=1e-6), "odd-shape mismatch"

    print("KERNEL_OK")
</pallas_src>

<mosaic_0001>
module attributes {stable_mosaic.version = 11 : i64} {
  func.func @_led_kernel(%arg0: i32, %arg1: memref<1xf32, #tpu.memory_space<smem>>, %arg2: memref<2x1024xf32, #tpu.memory_space<vmem>>, %arg3: memref<2x1024xf32, #tpu.memory_space<vmem>>) attributes {dimension_semantics = [#tpu.dimension_semantics<parallel>], iteration_bounds = array<i64: 1>, scalar_prefetch = 0 : i64, scratch_operands = 0 : i64, tpu.core_type = #tpu.core_type<tc>, window_params = [{transform_indices = @transform_0, window_bounds = array<i64: 1>}, {transform_indices = @transform_1, window_bounds = array<i64: 2, 1024>}, {transform_indices = @transform_2, window_bounds = array<i64: 2, 1024>}]} {
    %c0 = arith.constant 0 : index
    %c0_0 = arith.constant 0 : index
    %0 = vector.load %arg2[%c0, %c0_0] : memref<2x1024xf32, #tpu.memory_space<vmem>>, vector<2x1024xf32>
    %c0_1 = arith.constant 0 : index
    %1 = memref.load %arg1[%c0_1] : memref<1xf32, #tpu.memory_space<smem>>
    %2 = vector.broadcast %1 : f32 to vector<2x1024xf32>
    %3 = arith.mulf %0, %2 : vector<2x1024xf32>
    %c0_2 = arith.constant 0 : index
    %c0_3 = arith.constant 0 : index
    %4 = vector.load %arg3[%c0_2, %c0_3] : memref<2x1024xf32, #tpu.memory_space<vmem>>, vector<2x1024xf32>
    tpu.vector_store %arg3[%c0_2, %c0_3], %3 {strides = array<i32>} : memref<2x1024xf32, #tpu.memory_space<vmem>>, vector<2x1024xf32>,
    return
  }
  func.func @transform_0(%arg0: i32) -> i32 {
    %c0_i32 = arith.constant 0 : i32
    %c0_i32_0 = arith.constant 0 : i32
    return %c0_i32 : i32
  }
  func.func @transform_1(%arg0: i32) -> (i32, i32) {
    %c0_i32 = arith.constant 0 : i32
    %c0_i32_0 = arith.constant 0 : i32
    return %arg0, %c0_i32 : i32, i32
  }
  func.func @transform_2(%arg0: i32) -> (i32, i32) {
    %c0_i32 = arith.constant 0 : i32
    %c0_i32_0 = arith.constant 0 : i32
    return %arg0, %c0_i32 : i32, i32
  }
}

</mosaic_0001>

<bundles_post_ra>
// kernel: tpu_custom_call.1
= control target key start
LH: loop header
LB: loop body
LE: loop exit
PB: predicated region body
PF: predicated region fallthrough
CT: control target
= control target key end

     0   :  { %8 = vsyncpa [#allocation4], 0  ;;  %s132_s0 = inlined_call_operand.<no memory space> [shape: f32[1], index: 0, kind: input, shape index: {}]   ;;  %s133_s1 = inlined_call_operand.hbm [shape: f32[2,1024], index: 1, kind: input, shape index: {}]   ;;  %s134_s2 = inlined_call_operand.hbm [shape: f32[2,1024], index: 2, kind: output, shape index: {}]  }
   0x1   :  { %9 = vsyncpa [#allocation5], 0  ;;  %s17_s11 = sshll.u32 %s133_s1, 4  ;;  %s106_s12 = smov [#allocation3]   ;;  %s18_s11 = int_to_ptr.hbm [resolvable:$true] %s17_s11 }
   0x2   :  { %s19_s13 = sshll.u32 %s106_s12, 4  ;;  %s20_s13 = int_to_ptr.vmem [resolvable:$true] %s19_s13 }
   0x3   :  { %22 = dma.hbm_to_vmem [thread:$0]  %s18_s11, 256, %s20_s13, [#allocation4]  }
   0x4   :  { %102 = dma.done.wait [#allocation4], 256  }
   0x5   :  { %103 = vsyncadd [#allocation4], 4294967040  ;;  %v30_v0 = vstv %s132_s0  ;;  %s107_s16 = smov [#allocation6]   ;;  %s42_s20 = sshll.u32 %s134_s2, 4  ;;  %v27_v1 = vld [vmem:[#allocation3] sm:$0xff]  ;;  %v28_v2 = vld [vmem:[#allocation3 + $0x8] sm:$0xff]  ;;  %s43_s20 = int_to_ptr.hbm [resolvable:$true] %s42_s20 }
   0x6   :  { %s40_s17 = sshll.u32 %s107_s16, 4  ;;  %v31_v3 = vmul.f32 %v30_v0, %v27_v1  ;;  %v32_v4 = vmul.f32 %v30_v0, %v28_v2  ;;  %s41_s17 = int_to_ptr.vmem [resolvable:$true] %s40_s17 }
   0x8   :  { %33 = vst [vmem:[#allocation6] sm:$0xff] %v31_v3 }
   0x9   :  { %34 = vst [vmem:[#allocation6 + $0x8] sm:$0xff] %v32_v4 }
   0xa   :  { %45 = dma.vmem_to_hbm [thread:$0]  %s41_s17, 256, %s43_s20, [#allocation5]  }
   0xb   :  { %104 = dma.done.wait [#allocation5], 256  }
   0xc   :  { %105 = vsyncadd [#allocation5], 4294967040 }
   0xd   :  { %50 = vsyncpa [#allocation4], 1 }
   0xe   :  { %51 = vsyncpa [#allocation5], 1 }

</bundles_post_ra>
